<compile_context>
chip_gen: v5e
topology: v5e:2x2
jax: 0.10.0
libtpu: 0.0.40
codegen_flags: <defaults>
</compile_context>

<pallas_src>
import functools

import jax
import jax.numpy as jnp
from jax.experimental import pallas as pl
from jax.experimental.pallas import tpu as pltpu


_VMEM_LIMIT_BYTES = 48 * 1024 * 1024   # < v7x 64 MiB physical VMEM, > defaults.
_FUSED_TILE_BYTES = 4 * 1024 * 1024    # (G, BR, L) slab; ~4-6x live with buffers.
_STATS_TILE_BYTES = 6 * 1024 * 1024    # stats pass double-buffers its input only.
_APPLY_TILE_BYTES = 6 * 1024 * 1024    # apply pass holds in + out double-buffered.


def _sublane_multiple(dtype):
    # Sub-32-bit dtypes pack along sublanes: keep row blocks vreg-aligned.
    return {4: 8, 2: 16, 1: 32}.get(jnp.dtype(dtype).itemsize, 8)


# ----------------------------------------------------------------------------
# Fused single-pass kernels (1 read + 1 write of x)
# ----------------------------------------------------------------------------
def _slab_mean_rstd(x, eps):
    """x: (G, BR, L) f32 -> per-row (1, BR, 1) mean and rstd."""
    cnt = jnp.float32(x.shape[0] * x.shape[2])
    s = jnp.sum(jnp.sum(x, axis=0, keepdims=True), axis=2, keepdims=True)
    mean = s / cnt
    xc = x - mean
    m2 = jnp.sum(jnp.sum(xc * xc, axis=0, keepdims=True), axis=2, keepdims=True)
    rstd = jax.lax.rsqrt(m2 / cnt + jnp.float32(eps))
    return mean, rstd


def _fused_affine_kernel(x_ref, g_ref, b_ref, o_ref, *, eps):
    x = x_ref[...].astype(jnp.float32)                 # (G, BR, L)
    mean, rstd = _slab_mean_rstd(x, eps)
    scale = g_ref[...].astype(jnp.float32)[None] * rstd          # (1, BR, 1)
    shift = b_ref[...].astype(jnp.float32)[None] - mean * scale  # (1, BR, 1)
    o_ref[...] = (x * scale + shift).astype(o_ref.dtype)


def _fused_plain_kernel(x_ref, o_ref, *, eps):
    x = x_ref[...].astype(jnp.float32)                 # (G, BR, L)
    mean, rstd = _slab_mean_rstd(x, eps)
    o_ref[...] = ((x - mean) * rstd).astype(o_ref.dtype)


# ----------------------------------------------------------------------------
# Two-pass fallback kernels (tiled reduction, large shapes)
# ----------------------------------------------------------------------------
def _accumulate_tile(x_ref, mean_acc, m2_acc, *, L, TL, ragged):
    """Chan parallel-variance combine of one (BR, TL) tile into running stats."""
    g = pl.program_id(1)
    l = pl.program_id(2)

    @pl.when(jnp.logical_and(g == 0, l == 0))
    def _():
        mean_acc[...] = jnp.zeros_like(mean_acc)
        m2_acc[...] = jnp.zeros_like(m2_acc)

    x = x_ref[0].astype(jnp.float32)                   # (BR, TL)
    if ragged:
        # Last lane tile is partial: mask out the padded lanes.
        valid = jnp.minimum(TL, L - l * TL)            # int32 scalar, >= 1
        lane = jax.lax.broadcasted_iota(jnp.int32, x.shape, 1)
        mask = lane < valid
        n_b = valid.astype(jnp.float32)
        t_mean = jnp.sum(jnp.where(mask, x, 0.0), axis=-1, keepdims=True) / n_b
        xc = jnp.where(mask, x - t_mean, 0.0)
    else:
        n_b = jnp.float32(TL)
        t_mean = jnp.mean(x, axis=-1, keepdims=True)
        xc = x - t_mean
    t_m2 = jnp.sum(xc * xc, axis=-1, keepdims=True)    # (BR, 1)

    # Exact integer element count already accumulated (only the last lane tile
    # of each g is ragged, so every earlier tile was full).
    n_a = (g * L + l * TL).astype(jnp.float32)
    tot = n_a + n_b
    delta = t_mean - mean_acc[...]
    mean_acc[...] = mean_acc[...] + delta * (n_b / tot)
    m2_acc[...] = m2_acc[...] + t_m2 + delta * delta * (n_a * n_b / tot)


def _is_last_reduce_step():
    return jnp.logical_and(pl.program_id(1) == pl.num_programs(1) - 1,
                           pl.program_id(2) == pl.num_programs(2) - 1)


def _stats_affine_kernel(x_ref, g_ref, b_ref, ss_ref, mean_acc, m2_acc,
                         *, eps, L, TL, total_count, ragged):
    """Pass 1 (batch mode): per-row mean/var -> packed (scale, shift) with affine."""
    _accumulate_tile(x_ref, mean_acc, m2_acc, L=L, TL=TL, ragged=ragged)

    @pl.when(_is_last_reduce_step())
    def _():
        var = m2_acc[...] / jnp.float32(total_count)   # biased variance
        rstd = jax.lax.rsqrt(var + jnp.float32(eps))
        scale = g_ref[...].astype(jnp.float32) * rstd
        ss_ref[:, 0:1] = scale
        ss_ref[:, 1:2] = b_ref[...].astype(jnp.float32) - mean_acc[...] * scale


def _stats_plain_kernel(x_ref, ss_ref, mean_acc, m2_acc,
                        *, eps, L, TL, total_count, ragged):
    """Pass 1 (instance mode): per-row mean/var -> packed (scale, shift), no affine."""
    _accumulate_tile(x_ref, mean_acc, m2_acc, L=L, TL=TL, ragged=ragged)

    @pl.when(_is_last_reduce_step())
    def _():
        var = m2_acc[...] / jnp.float32(total_count)
        rstd = jax.lax.rsqrt(var + jnp.float32(eps))
        ss_ref[:, 0:1] = rstd
        ss_ref[:, 1:2] = -mean_acc[...] * rstd


def _apply_kernel(x_ref, ss_ref, o_ref):
    """Pass 2: y = x * scale + shift (single FMA per element)."""
    x = x_ref[0].astype(jnp.float32)                   # (BR, TL)
    scale = ss_ref[:, 0:1]
    shift = ss_ref[:, 1:2]
    o_ref[0] = (x * scale + shift).astype(o_ref.dtype)


# ----------------------------------------------------------------------------
# Tile selection
# ----------------------------------------------------------------------------
def _fused_rows(G, R, L, itemsize, sub, limit):
    """Row-block size for the fused path, or None if the slab does not fit."""
    row_bytes = G * L * itemsize
    if row_bytes <= 0:
        return None
    if R % sub != 0:
        # Only a full-R block is legal without padding.
        return R if R * row_bytes <= limit else None
    max_rows = limit // row_bytes
    if max_rows < sub:
        return None
    cap = R // 2 if R >= 2 * sub else R        # keep >= 2 row blocks (megacore)
    cap = min(cap, max_rows)
    cap = max(sub, (cap // sub) * sub)
    b = min(cap, R)
    while b >= sub:
        if R % b == 0:
            return b
        b -= sub
    return sub                                  # sub always divides R here


def _choose_two_pass_tiles(R, L, itemsize, sub, target_bytes):
    """(BR, TL) for the tiled two-pass path; TL may leave a ragged last tile."""
    if R % sub != 0:
        br = R                                   # full dim: always legal
    else:
        want = max(sub, target_bytes // max(1, L * itemsize))
        if R >= 2 * sub:
            want = min(want, R // 2)             # parallel row extent >= 2
        want = max(sub, (want // sub) * sub)
        want = min(want, R)
        br = sub
        b = want
        while b >= sub:
            if R % b == 0:
                br = b
                break
            b -= sub
    max_lanes = max(128, (target_bytes // max(1, br * itemsize)) // 128 * 128)
    tl = L if L <= max_lanes else max_lanes      # multiple of 128 when tiled
    return br, tl


# ----------------------------------------------------------------------------
# Pallas wrappers
# ----------------------------------------------------------------------------
def _norm3d(x3, gamma, beta, eps, *, fused_tile_bytes=_FUSED_TILE_BYTES,
            stats_tile_bytes=_STATS_TILE_BYTES,
            apply_tile_bytes=_APPLY_TILE_BYTES):
    """x3: (G, R, L). Normalize each row r over axes (G, L); optional affine."""
    G, R, L = x3.shape
    itemsize = x3.dtype.itemsize
    sub = _sublane_multiple(x3.dtype)
    affine = gamma is not None

    # ---------------- fused single-pass path ----------------
    br_f = _fused_rows(G, R, L, itemsize, sub, fused_tile_bytes)
    if br_f is not None:
        grid = (R // br_f,)
        x_spec = pl.BlockSpec((G, br_f, L), lambda r: (0, r, 0))
        row_spec = pl.BlockSpec((br_f, 1), lambda r: (r, 0))
        if affine:
            kernel = functools.partial(_fused_affine_kernel, eps=eps)
            in_specs = [x_spec, row_spec, row_spec]
            args = (x3, gamma.reshape(R, 1), beta.reshape(R, 1))
        else:
            kernel = functools.partial(_fused_plain_kernel, eps=eps)
            in_specs = [x_spec]
            args = (x3,)
        return pl.pallas_call(
            kernel,
            out_shape=jax.ShapeDtypeStruct(x3.shape, x3.dtype),
            grid_spec=pltpu.PrefetchScalarGridSpec(
                num_scalar_prefetch=0, grid=grid,
                in_specs=in_specs, out_specs=x_spec),
            compiler_params=pltpu.CompilerParams(
                dimension_semantics=("parallel",),
                vmem_limit_bytes=_VMEM_LIMIT_BYTES),
        )(*args)

    # ---------------- two-pass fallback (large shapes) ----------------
    # Pass 1: per-row fused scale/shift packed as one (R, 2) array.
    br_s, tl_s = _choose_two_pass_tiles(R, L, itemsize, sub, stats_tile_bytes)
    grid_s = (R // br_s, G, pl.cdiv(L, tl_s))
    x_spec_s = pl.BlockSpec((1, br_s, tl_s), lambda r, g, l: (g, r, l))
    row_spec_s = pl.BlockSpec((br_s, 1), lambda r, g, l: (r, 0))
    ss_spec_s = pl.BlockSpec((br_s, 2), lambda r, g, l: (r, 0))

    common = dict(eps=eps, L=L, TL=tl_s, total_count=G * L,
                  ragged=(L % tl_s != 0))
    if affine:
        stats_kernel = functools.partial(_stats_affine_kernel, **common)
        stats_in_specs = [x_spec_s, row_spec_s, row_spec_s]
        stats_args = (x3, gamma.reshape(R, 1), beta.reshape(R, 1))
    else:
        stats_kernel = functools.partial(_stats_plain_kernel, **common)
        stats_in_specs = [x_spec_s]
        stats_args = (x3,)

    ss = pl.pallas_call(
        stats_kernel,
        out_shape=jax.ShapeDtypeStruct((R, 2), jnp.float32),
        grid_spec=pltpu.PrefetchScalarGridSpec(
            num_scalar_prefetch=0, grid=grid_s,
            in_specs=stats_in_specs, out_specs=ss_spec_s,
            scratch_shapes=[pltpu.VMEM((br_s, 1), jnp.float32),
                            pltpu.VMEM((br_s, 1), jnp.float32)]),
        compiler_params=pltpu.CompilerParams(
            dimension_semantics=("parallel", "arbitrary", "arbitrary"),
            vmem_limit_bytes=_VMEM_LIMIT_BYTES),
    )(*stats_args)

    # Pass 2: elementwise y = x * scale + shift (lane-dense, all-parallel).
    br_a, tl_a = _choose_two_pass_tiles(R, L, itemsize, sub, apply_tile_bytes)
    grid_a = (R // br_a, G, pl.cdiv(L, tl_a))
    x_spec_a = pl.BlockSpec((1, br_a, tl_a), lambda r, g, l: (g, r, l))
    ss_spec_a = pl.BlockSpec((br_a, 2), lambda r, g, l: (r, 0))
    y3 = pl.pallas_call(
        _apply_kernel,
        out_shape=jax.ShapeDtypeStruct(x3.shape, x3.dtype),
        grid_spec=pltpu.PrefetchScalarGridSpec(
            num_scalar_prefetch=0, grid=grid_a,
            in_specs=[x_spec_a, ss_spec_a], out_specs=x_spec_a),
        compiler_params=pltpu.CompilerParams(
            dimension_semantics=("parallel", "parallel", "parallel"),
            vmem_limit_bytes=_VMEM_LIMIT_BYTES),
    )(x3, ss)
    return y3


def norm2d(x, mode, gamma=None, beta=None, eps=1e-5, *,
           fused_tile_bytes=_FUSED_TILE_BYTES,
           stats_tile_bytes=_STATS_TILE_BYTES,
           apply_tile_bytes=_APPLY_TILE_BYTES):
    """Forward pass of Norm2d(dim, mode) on NCHW input x."""
    N, C, H, W = x.shape
    kw = dict(fused_tile_bytes=fused_tile_bytes,
              stats_tile_bytes=stats_tile_bytes,
              apply_tile_bytes=apply_tile_bytes)
    if mode == "batch":
        # nn.BatchNorm2d (training-mode stats, affine): per-channel over (N,H,W).
        x3 = x.reshape(N, C, H * W)                 # free view, no transpose
        return _norm3d(x3, gamma, beta, eps, **kw).reshape(N, C, H, W)
    elif mode == "instance":
        # nn.InstanceNorm2d (affine=False): per-(n,c) over (H,W).
        x3 = x.reshape(1, N * C, H * W)
        return _norm3d(x3, None, None, eps, **kw).reshape(N, C, H, W)
    elif mode == "none":
        # Identity: no data movement needed.
        return x
    else:
        raise RuntimeError("norm argument has unknown value: " + mode)


# ----------------------------------------------------------------------------
# Pure-JAX references (correctness check only)
# ----------------------------------------------------------------------------
def _batchnorm_ref(x, gamma, beta, eps):
    x = x.astype(jnp.float32)
    mean = jnp.mean(x, axis=(0, 2, 3), keepdims=True)
    var = jnp.mean((x - mean) ** 2, axis=(0, 2, 3), keepdims=True)
    return (x - mean) / jnp.sqrt(var + eps) * gamma[None, :, None, None] \
        + beta[None, :, None, None]


def _instancenorm_ref(x, eps):
    x = x.astype(jnp.float32)
    mean = jnp.mean(x, axis=(2, 3), keepdims=True)
    var = jnp.mean((x - mean) ** 2, axis=(2, 3), keepdims=True)
    return (x - mean) / jnp.sqrt(var + eps)


if __name__ == "__main__":
    key = jax.random.PRNGKey(0)
    k1, k2, k3 = jax.random.split(key, 3)
    eps = 1e-5

    # 1) Primary small shape -> fused single-pass path.
    N, C, H, W = 2, 4, 16, 16
    x = jax.random.normal(k1, (N, C, H, W), dtype=jnp.float32)
    gamma = 1.0 + 0.1 * jax.random.normal(k2, (C,), dtype=jnp.float32)
    beta = 0.1 * jax.random.normal(k3, (C,), dtype=jnp.float32)

    y_batch = jax.block_until_ready(norm2d(x, "batch", gamma, beta, eps))
    y_inst = jax.block_until_ready(norm2d(x, "instance", eps=eps))
    y_none = jax.block_until_ready(norm2d(x, "none"))
    assert y_batch.shape == x.shape and y_inst.shape == x.shape
    assert jnp.allclose(y_batch, _batchnorm_ref(x, gamma, beta, eps),
                        atol=1e-4, rtol=1e-4)
    assert jnp.allclose(y_inst, _instancenorm_ref(x, eps), atol=1e-4, rtol=1e-4)
    assert jnp.allclose(y_none, x)

    # 2) Odd shapes (C not multiple of 8, H*W not multiple of 128) -> fused
    #    path with full-dim blocks.
    x2 = jax.random.normal(k1, (2, 3, 7, 9), dtype=jnp.float32)
    g2 = 1.0 + 0.05 * jax.random.normal(k2, (3,), dtype=jnp.float32)
    b2 = 0.05 * jax.random.normal(k3, (3,), dtype=jnp.float32)
    yb2 = jax.block_until_ready(norm2d(x2, "batch", g2, b2, eps))
    yi2 = jax.block_until_ready(norm2d(x2, "instance", eps=eps))
    assert jnp.allclose(yb2, _batchnorm_ref(x2, g2, b2, eps), atol=1e-4, rtol=1e-4)
    assert jnp.allclose(yi2, _instancenorm_ref(x2, eps), atol=1e-4, rtol=1e-4)

    # 3) Force the two-pass fallback with tiny tiles (exercises Chan combine,
    #    ragged lane masking, packed (R,2) scale/shift, multiple row blocks).
    x3 = jax.random.normal(k1, (2, 8, 16, 18), dtype=jnp.float32)  # L=288 ragged
    g3 = 1.0 + 0.1 * jax.random.normal(k2, (8,), dtype=jnp.float32)
    b3 = 0.1 * jax.random.normal(k3, (8,), dtype=jnp.float32)
    force = dict(fused_tile_bytes=0, stats_tile_bytes=4096, apply_tile_bytes=4096)
    yb3 = jax.block_until_ready(norm2d(x3, "batch", g3, b3, eps, **force))
    yi3 = jax.block_until_ready(norm2d(x3, "instance", eps=eps, **force))
    assert jnp.allclose(yb3, _batchnorm_ref(x3, g3, b3, eps), atol=1e-4, rtol=1e-4)
    assert jnp.allclose(yi3, _instancenorm_ref(x3, eps), atol=1e-4, rtol=1e-4)

    # 4) bf16 input (dtype-aware 16-sublane row blocks), fused path.
    x4 = jax.random.normal(k1, (2, 8, 16, 16), dtype=jnp.float32).astype(jnp.bfloat16)
    yi4 = jax.block_until_ready(norm2d(x4, "instance", eps=eps))
    ref4 = _instancenorm_ref(x4, eps)
    assert yi4.dtype == jnp.bfloat16
    assert jnp.allclose(yi4.astype(jnp.float32), ref4, atol=3e-2, rtol=3e-2)

    print("KERNEL_OK")
</pallas_src>

<mosaic_0001>
module attributes {stable_mosaic.version = 11 : i64} {
  func.func @_fused_affine_kernel(%arg0: i32, %arg1: memref<2x4x256xf32, #tpu.memory_space<vmem>>, %arg2: memref<4x1xf32, #tpu.memory_space<vmem>>, %arg3: memref<4x1xf32, #tpu.memory_space<vmem>>, %arg4: memref<2x4x256xf32, #tpu.memory_space<vmem>>) attributes {dimension_semantics = [#tpu.dimension_semantics<parallel>], iteration_bounds = array<i64: 1>, scalar_prefetch = 0 : i64, scratch_operands = 0 : i64, tpu.core_type = #tpu.core_type<tc>, window_params = [{transform_indices = @transform_0, window_bounds = array<i64: 2, 4, 256>}, {transform_indices = @transform_1, window_bounds = array<i64: 4, 1>}, {transform_indices = @transform_2, window_bounds = array<i64: 4, 1>}, {transform_indices = @transform_3, window_bounds = array<i64: 2, 4, 256>}]} {
    %c0 = arith.constant 0 : index
    %c0_0 = arith.constant 0 : index
    %c0_1 = arith.constant 0 : index
    %0 = vector.load %arg1[%c0, %c0_0, %c0_1] : memref<2x4x256xf32, #tpu.memory_space<vmem>>, vector<2x4x256xf32>
    %cst = arith.constant dense<0.000000e+00> : vector<4x256xf32>
    %1 = vector.multi_reduction <add>, %0, %cst [0] : vector<2x4x256xf32> to vector<4x256xf32>
    %2 = vector.shape_cast %1 : vector<4x256xf32> to vector<1x4x256xf32>
    %cst_2 = arith.constant dense<0.000000e+00> : vector<1x4xf32>
    %3 = vector.multi_reduction <add>, %2, %cst_2 [2] : vector<1x4x256xf32> to vector<1x4xf32>
    %4 = vector.shape_cast %3 : vector<1x4xf32> to vector<1x4x1xf32>
    %cst_3 = arith.constant 5.120000e+02 : f32
    %5 = vector.broadcast %cst_3 : f32 to vector<1x4x1xf32>
    %6 = arith.divf %4, %5 : vector<1x4x1xf32>
    %7 = vector.broadcast %6 : vector<1x4x1xf32> to vector<2x4x256xf32>
    %8 = arith.subf %0, %7 : vector<2x4x256xf32>
    %9 = arith.mulf %8, %8 : vector<2x4x256xf32>
    %cst_4 = arith.constant dense<0.000000e+00> : vector<4x256xf32>
    %10 = vector.multi_reduction <add>, %9, %cst_4 [0] : vector<2x4x256xf32> to vector<4x256xf32>
    %11 = vector.shape_cast %10 : vector<4x256xf32> to vector<1x4x256xf32>
    %cst_5 = arith.constant dense<0.000000e+00> : vector<1x4xf32>
    %12 = vector.multi_reduction <add>, %11, %cst_5 [2] : vector<1x4x256xf32> to vector<1x4xf32>
    %13 = vector.shape_cast %12 : vector<1x4xf32> to vector<1x4x1xf32>
    %cst_6 = arith.constant 5.120000e+02 : f32
    %14 = vector.broadcast %cst_6 : f32 to vector<1x4x1xf32>
    %15 = arith.divf %13, %14 : vector<1x4x1xf32>
    %cst_7 = arith.constant 9.99999974E-6 : f32
    %16 = vector.broadcast %cst_7 : f32 to vector<1x4x1xf32>
    %17 = arith.addf %15, %16 : vector<1x4x1xf32>
    %18 = math.rsqrt %17 : vector<1x4x1xf32>
    %c0_8 = arith.constant 0 : index
    %c0_9 = arith.constant 0 : index
    %19 = vector.load %arg2[%c0_8, %c0_9] : memref<4x1xf32, #tpu.memory_space<vmem>>, vector<4x1xf32>
    %20 = vector.shape_cast %19 : vector<4x1xf32> to vector<1x4x1xf32>
    %21 = arith.mulf %20, %18 : vector<1x4x1xf32>
    %c0_10 = arith.constant 0 : index
    %c0_11 = arith.constant 0 : index
    %22 = vector.load %arg3[%c0_10, %c0_11] : memref<4x1xf32, #tpu.memory_space<vmem>>, vector<4x1xf32>
    %23 = vector.shape_cast %22 : vector<4x1xf32> to vector<1x4x1xf32>
    %24 = arith.mulf %6, %21 : vector<1x4x1xf32>
    %25 = arith.subf %23, %24 : vector<1x4x1xf32>
    %26 = vector.broadcast %21 : vector<1x4x1xf32> to vector<2x4x256xf32>
    %27 = arith.mulf %0, %26 : vector<2x4x256xf32>
    %28 = vector.broadcast %25 : vector<1x4x1xf32> to vector<2x4x256xf32>
    %29 = arith.addf %27, %28 : vector<2x4x256xf32>
    %c0_12 = arith.constant 0 : index
    %c0_13 = arith.constant 0 : index
    %c0_14 = arith.constant 0 : index
    %30 = vector.load %arg4[%c0_12, %c0_13, %c0_14] : memref<2x4x256xf32, #tpu.memory_space<vmem>>, vector<2x4x256xf32>
    tpu.vector_store %arg4[%c0_12, %c0_13, %c0_14], %29 {strides = array<i32>} : memref<2x4x256xf32, #tpu.memory_space<vmem>>, vector<2x4x256xf32>,
    return
  }
  func.func @transform_0(%arg0: i32) -> (i32, i32, i32) {
    %c0_i32 = arith.constant 0 : i32
    %c0_i32_0 = arith.constant 0 : i32
    %c0_i32_1 = arith.constant 0 : i32
    return %c0_i32, %arg0, %c0_i32_0 : i32, i32, i32
  }
  func.func @transform_1(%arg0: i32) -> (i32, i32) {
    %c0_i32 = arith.constant 0 : i32
    %c0_i32_0 = arith.constant 0 : i32
    return %arg0, %c0_i32 : i32, i32
  }
  func.func @transform_2(%arg0: i32) -> (i32, i32) {
    %c0_i32 = arith.constant 0 : i32
    %c0_i32_0 = arith.constant 0 : i32
    return %arg0, %c0_i32 : i32, i32
  }
  func.func @transform_3(%arg0: i32) -> (i32, i32, i32) {
    %c0_i32 = arith.constant 0 : i32
    %c0_i32_0 = arith.constant 0 : i32
    %c0_i32_1 = arith.constant 0 : i32
    return %c0_i32, %arg0, %c0_i32_0 : i32, i32, i32
  }
}

</mosaic_0001>

<bundles_post_ra>
// kernel: tpu_custom_call.1
= control target key start
LH: loop header
LB: loop body
LE: loop exit
PB: predicated region body
PF: predicated region fallthrough
CT: control target
= control target key end

     0   :  { %8 = vsyncpa [#allocation3], 0  ;;  %s292_s0 = inlined_call_operand.hbm [shape: f32[2,4,256], index: 0, kind: input, shape index: {}]   ;;  %s293_s1 = inlined_call_operand.vmem [shape: f32[4,1], index: 1, kind: input, shape index: {}]   ;;  %s294_s2 = inlined_call_operand.vmem [shape: f32[4,1], index: 2, kind: input, shape index: {}]   ;;  %s295_s3 = inlined_call_operand.hbm [shape: f32[2,4,256], index: 3, kind: output, shape index: {}]  }
   0x1   :  { %9 = vsyncpa [#allocation4], 0  ;;  %s14_s14 = sshll.u32 %s292_s0, 4  ;;  %s225_s15 = smov [#allocation2]   ;;  %s15_s14 = int_to_ptr.hbm [resolvable:$true] %s14_s14 }
   0x2   :  { %s16_s16 = sshll.u32 %s225_s15, 4  ;;  %s226_s17 = smov 128   ;;  %s17_s16 = int_to_ptr.vmem [resolvable:$true] %s16_s16 }
   0x3   :  { %s227_s18 = smov 8  }
   0x4   :  { %22 = dma.hbm_to_vmem [thread:$0]  %s15_s14, 256, %s17_s16, [#allocation3], %s226_s17, %s226_s17, %s227_s18  }
   0x5   :  { %221 = dma.done.wait [#allocation3], 256  }
   0x6   :  { %222 = vsyncadd [#allocation3], 4294967040  ;;  %v258_v0 = vld [vmem:[#allocation2] sm:$0xff]  ;;  %v260_v1 = vld [vmem:[#allocation2 + $0x8] sm:$0xff]  ;;  %vm46_vm0 = vcmask 1043456   ;;  %v228_v15 = vmov 512.0  }
   0x7   :  { %35 = vst [vmem:[#allocation1] ss:$2 sm:$0xff] %v258_v0  ;;  %169 = vrcp.f32 %v228_v15  ;;  %v229_v21 = vmov 839922192   ;;  %v230_v45 = vmov 0   ;;  %s147_s25 = sshll.u32 %s295_s3, 4  ;;  %s148_s25 = int_to_ptr.hbm [resolvable:$true] %s147_s25 }
   0x8   :  { %39 = vst [vmem:[#allocation1 + $0x10] ss:$2 sm:$0xff] %v260_v1  ;;  %v68_v22 = vunpack.c.l.s4 %v229_v21  ;;  %167 = vset.pattern.permute.xlu1 %v230_v45  ;;  %168 = vset.pattern.permute.xlu0 %v230_v45  ;;  %v112_v55 = vld [vmem:[%s293_s1] sm:$0xf]  ;;  %s231_s1 = smov [#allocation5]  }
   0x9   :  { %v114_v59 = vld [vmem:[%s294_s2] sm:$0xf]  ;;  %s145_s22 = sshll.u32 %s231_s1, 4  ;;  %s146_s22 = int_to_ptr.vmem [resolvable:$true] %s145_s22 }
   0xa   :  { %v69_v24 = vunpack.c.0.s8 %v68_v22 }
   0xd   :  { %v170_v16 = vpop.eup %169 }
   0xe   :  { %v36_v2 = vld.sshfl [vmem:[#allocation1] sm:$0xff pattern:$0x75316420]  ;;  %v37_v3 = vld.sshfl [vmem:[#allocation1 + $0x8] sm:$0xff pattern:$0x75316420]  ;;  %vm63_vm1 = vweird.f32 %v170_v16 }
   0xf   :  { %v40_v4 = vld.sshfl [vmem:[#allocation1 + $0x10] sm:$0xff pattern:$0x75316420]  ;;  %v41_v5 = vld.sshfl [vmem:[#allocation1 + $0x18] sm:$0xff pattern:$0x75316420] }
  0x10   :  { %v47_v6 = vsel %vm46_vm0, %v36_v2, 0.0  ;;  %v48_v7 = vsel %vm46_vm0, %v40_v4, 0.0  ;;  %v50_v8 = vsel %vm46_vm0, %v37_v3, 0.0  ;;  %v51_v9 = vsel %vm46_vm0, %v41_v5, 0.0 }
  0x11   :  { %v49_v10 = vadd.f32 %v48_v7, %v47_v6  ;;  %v52_v11 = vadd.f32 %v51_v9, %v50_v8  ;;  %v59_v17 = vmul.f32 512.0, %v170_v16 }
  0x13   :  { %v53_v12 = vsel %vm46_vm0, %v49_v10, 0.0  ;;  %v54_v13 = vsel %vm46_vm0, %v52_v11, 0.0  ;;  %v60_v18 = vsub.f32 1.0, %v59_v17 }
  0x14   :  { %v55_v14 = vadd.f32 %v54_v13, %v53_v12 }
  0x15   :  { %v61_v19 = vmul.f32 %v170_v16, %v60_v18 }
  0x16   :  { %56 = vadd.xlane.f32.xlu0 %v55_v14 }
  0x17   :  { %v62_v20 = vadd.f32 %v170_v16, %v61_v19 }
  0x19   :  { %v64_v23 = vsel %vm63_vm1, %v170_v16, %v62_v20 }
  0x89   :  { %v57_v25 = vpop.xlane.xlu0 %56 }
  0x8a   :  { %v65_v26 = vmul.f32 %v64_v23, %v57_v25 }
  0x8c   :  { %v70_v27 = vperm.slane %v65_v26, %v69_v24 }
  0x8e   :  { %v72_v28 = vsub.f32 %v258_v0, %v70_v27  ;;  %v73_v29 = vsub.f32 %v260_v1, %v70_v27 }
  0x90   :  { %v74_v30 = vmul.f32 %v72_v28, %v72_v28  ;;  %v75_v31 = vmul.f32 %v73_v29, %v73_v29 }
  0x92   :  { %78 = vst [vmem:[#allocation1] ss:$2 sm:$0xff] %v74_v30 }
  0x93   :  { %82 = vst [vmem:[#allocation1 + $0x10] ss:$2 sm:$0xff] %v75_v31 }
  0x99   :  { %v79_v32 = vld.sshfl [vmem:[#allocation1] sm:$0xff pattern:$0x75316420]  ;;  %v80_v33 = vld.sshfl [vmem:[#allocation1 + $0x8] sm:$0xff pattern:$0x75316420] }
  0x9a   :  { %v83_v34 = vld.sshfl [vmem:[#allocation1 + $0x10] sm:$0xff pattern:$0x75316420]  ;;  %v84_v35 = vld.sshfl [vmem:[#allocation1 + $0x18] sm:$0xff pattern:$0x75316420] }
  0x9b   :  { %v89_v36 = vsel %vm46_vm0, %v79_v32, 0.0  ;;  %v90_v37 = vsel %vm46_vm0, %v83_v34, 0.0  ;;  %v92_v38 = vsel %vm46_vm0, %v80_v33, 0.0  ;;  %v93_v39 = vsel %vm46_vm0, %v84_v35, 0.0 }
  0x9c   :  { %v91_v40 = vadd.f32 %v90_v37, %v89_v36  ;;  %v94_v41 = vadd.f32 %v93_v39, %v92_v38 }
  0x9e   :  { %v95_v42 = vsel %vm46_vm0, %v91_v40, 0.0  ;;  %v96_v43 = vsel %vm46_vm0, %v94_v41, 0.0 }
  0x9f   :  { %v97_v44 = vadd.f32 %v96_v43, %v95_v42 }
  0xa1   :  { %98 = vadd.xlane.f32.xlu0 %v97_v44 }
 0x114   :  { %v99_v46 = vpop.xlane.xlu0 %98 }
 0x115   :  { %v100_v47 = vmul.f32 %v99_v46, %v64_v23 }
 0x117   :  { %v101_v48 = vadd.f32 1e-05, %v100_v47 }
 0x119   :  { %171 = vrsqrt.f32 %v101_v48  ;;  %vm108_vm3 = vweird.f32 %v101_v48 }
 0x11f   :  { %v172_v49 = vpop.eup %171 }
 0x120   :  { %v103_v50 = vmul.f32 %v172_v49, %v101_v48  ;;  %vm109_vm2 = vweird.f32 %v172_v49 }
 0x121   :  { %vm110_vm4 = vmor %vm108_vm3, %vm109_vm2 }
 0x122   :  { %v104_v51 = vmul.f32 %v172_v49, %v103_v50 }
 0x124   :  { %v105_v52 = vmul.f32 0.5, %v104_v51 }
 0x126   :  { %v106_v53 = vsub.f32 1.5, %v105_v52 }
 0x128   :  { %v107_v54 = vmul.f32 %v172_v49, %v106_v53 }
 0x12a   :  { %v111_v56 = vsel %vm110_vm4, %v172_v49, %v107_v54 }
 0x12b   :  { %v113_v57 = vmul.f32 %v112_v55, %v111_v56 }
 0x12d   :  { %119 = vperm.xlu1 %167, %v113_v57   ;;  %v115_v58 = vmul.f32 %v113_v57, %v65_v26 }
 0x12f   :  { %v116_v60 = vsub.f32 %v114_v59, %v115_v58 }
 0x135   :  { %130 = vperm.xlu1 %167, %v116_v60  }
 0x19f   :  { %v120_v61 = vpop.permute.xlu1 %119 }
 0x1a0   :  { %v124_v62 = vperm.slane %v120_v61, %v69_v24 }
 0x1a2   :  { %v126_v2 = vmul.f32 %v124_v62, %v258_v0  ;;  %v127_v3 = vmul.f32 %v124_v62, %v260_v1 }
 0x1a7   :  { %v131_v63 = vpop.permute.xlu1 %130 }
 0x1a8   :  { %v135_v4 = vperm.slane %v131_v63, %v69_v24 }
 0x1aa   :  { %v137_v5 = vadd.f32 %v135_v4, %v126_v2  ;;  %v138_v6 = vadd.f32 %v135_v4, %v127_v3 }
 0x1ac   :  { %139 = vst [vmem:[#allocation5] sm:$0xff] %v137_v5 }
 0x1ad   :  { %140 = vst [vmem:[#allocation5 + $0x8] sm:$0xff] %v138_v6 }
 0x1ae   :  { %153 = dma.vmem_to_hbm [thread:$0]  %s146_s22, 256, %s148_s25, [#allocation4], %s226_s17, %s226_s17, %s227_s18  }
 0x1af   :  { %223 = dma.done.wait [#allocation4], 256  }
 0x1b0   :  { %224 = vsyncadd [#allocation4], 4294967040 }
 0x1b1   :  { %158 = vsyncpa [#allocation3], 1 }
 0x1b2   :  { %159 = vsyncpa [#allocation4], 1 }

</bundles_post_ra>
